<compile_context>
chip_gen: v6e
topology: v6e:2x2x1
jax: 0.10.0
libtpu: 0.0.40
codegen_flags: <defaults>
</compile_context>

<pallas_src>
import math
import jax
import jax.numpy as jnp
from jax.experimental import pallas as pl
from jax.experimental.pallas import tpu as pltpu

KPAD = 16  # 7 input features padded to 16 (bf16 sublane tile) with zeros


def _round_up(n, m):
    return ((n + m - 1) // m) * m


def mlp_kernel(xt_ref, w1_ref, b1_ref, w2_ref, b2_ref,
               w3_ref, b3_ref, w4_ref, b4_ref, o_ref):
    # All activations are (features, TILE_B): lane axis = batch tile.
    x = xt_ref[...]                                                     # (16, TB) bf16
    h = jnp.dot(w1_ref[...], x, preferred_element_type=jnp.float32)     # (128, TB) f32
    h = jnp.maximum(h + b1_ref[...], 0.0)
    h = jnp.dot(w2_ref[...], h.astype(jnp.bfloat16),
                preferred_element_type=jnp.float32)
    h = jnp.maximum(h + b2_ref[...], 0.0)
    h = jnp.dot(w3_ref[...], h.astype(jnp.bfloat16),
                preferred_element_type=jnp.float32)
    h = jnp.maximum(h + b3_ref[...], 0.0)
    # Final Linear(128, 1): N=1 matmul would use <1% of the MXU -> do a VPU
    # multiply + sublane reduce; output stays lane-dense as (1, TB).
    out = jnp.sum(h * w4_ref[...], axis=0, keepdims=True) + b4_ref[...]  # (1, TB)
    o_ref[...] = out.astype(o_ref.dtype)


def prepare_params(params):
    """One-time conversion from PyTorch-layout params (W: (out,in), b: (out,))
    to the kernel layout: bf16 weights for the MXU, f32 biases as columns,
    first-layer K padded 7->KPAD, last layer as a (128,1) f32 column."""
    w1 = jnp.zeros((128, KPAD), jnp.bfloat16).at[:, :7].set(
        params["w1"].astype(jnp.bfloat16))
    return dict(
        w1=w1,
        b1=params["b1"].reshape(128, 1).astype(jnp.float32),
        w2=params["w2"].astype(jnp.bfloat16),
        b2=params["b2"].reshape(128, 1).astype(jnp.float32),
        w3=params["w3"].astype(jnp.bfloat16),
        b3=params["b3"].reshape(128, 1).astype(jnp.float32),
        w4=params["w4"].reshape(1, 128).T.astype(jnp.float32),   # (128, 1)
        b4=params["b4"].reshape(1, 1).astype(jnp.float32),
    )


def mlp_forward(x, kp, tile_b=512):
    """x: (B, 7) float32. kp: prepare_params(...) output. Returns (B, 1) float32."""
    B, K = x.shape
    assert K == 7 and tile_b % 128 == 0
    TB = min(tile_b, _round_up(B, 128))      # lane-dense tile, >= 128
    B_pad = _round_up(B, TB)

    # Batch on the lane axis: pad K 7->KPAD, transpose, cast to bf16.
    xt = jnp.zeros((KPAD, B_pad), jnp.bfloat16).at[:7, :B].set(
        x.T.astype(jnp.bfloat16))

    resident = lambda shape: pl.BlockSpec(shape, lambda i: (0, 0))

    out = pl.pallas_call(
        mlp_kernel,
        out_shape=jax.ShapeDtypeStruct((1, B_pad), jnp.float32),
        grid=(B_pad // TB,),
        in_specs=[
            pl.BlockSpec((KPAD, TB), lambda i: (0, i)),   # x tiles stream
            resident((128, KPAD)), resident((128, 1)),    # weights/biases pinned
            resident((128, 128)),  resident((128, 1)),
            resident((128, 128)),  resident((128, 1)),
            resident((128, 1)),    resident((1, 1)),
        ],
        out_specs=pl.BlockSpec((1, TB), lambda i: (0, i)),
        compiler_params=pltpu.CompilerParams(
            dimension_semantics=("parallel",),            # megacore sharding on v7x
            vmem_limit_bytes=32 << 20),
    )(xt, kp["w1"], kp["b1"], kp["w2"], kp["b2"],
      kp["w3"], kp["b3"], kp["w4"], kp["b4"])

    return out[:, :B].T                                   # (B, 1)


def init_linear(key, fan_in, fan_out):
    """PyTorch-style init (kaiming_uniform(a=sqrt(5)) -> U(±1/sqrt(fan_in)));
    weight stored PyTorch-style as (out_features, in_features)."""
    kw, kb = jax.random.split(key)
    bound = 1.0 / math.sqrt(fan_in)
    w = jax.random.uniform(kw, (fan_out, fan_in), jnp.float32, -bound, bound)
    b = jax.random.uniform(kb, (fan_out,), jnp.float32, -bound, bound)
    return w, b


def make_params(key):
    k1, k2, k3, k4 = jax.random.split(key, 4)
    w1, b1 = init_linear(k1, 7, 128)
    w2, b2 = init_linear(k2, 128, 128)
    w3, b3 = init_linear(k3, 128, 128)
    w4, b4 = init_linear(k4, 128, 1)
    return dict(w1=w1, b1=b1, w2=w2, b2=b2, w3=w3, b3=b3, w4=w4, b4=b4)


def mlp_reference(x, p):
    """Pure-JAX f32 reference matching the PyTorch module exactly."""
    h = jnp.maximum(x @ p["w1"].T + p["b1"], 0.0)
    h = jnp.maximum(h @ p["w2"].T + p["b2"], 0.0)
    h = jnp.maximum(h @ p["w3"].T + p["b3"], 0.0)
    return h @ p["w4"].T + p["b4"]


if __name__ == "__main__":
    key = jax.random.PRNGKey(0)
    kx, kp = jax.random.split(key)

    batch = 8
    x = jax.random.normal(kx, (batch, 7), dtype=jnp.float32)
    params = make_params(kp)
    kparams = prepare_params(params)   # one-time layout/dtype conversion

    out = mlp_forward(x, kparams)
    out = jax.block_until_ready(out)

    ref = mlp_reference(x, params)
    assert out.shape == (batch, 1), out.shape
    # bf16 matmul operands (f32 accumulate) -> looser tolerance than pure f32.
    assert jnp.allclose(out, ref, atol=5e-2, rtol=5e-2), \
        float(jnp.max(jnp.abs(out - ref)))

    print("KERNEL_OK")
</pallas_src>

<mosaic_0001>
module attributes {stable_mosaic.version = 11 : i64} {
  func.func @mlp_kernel(%arg0: i32, %arg1: memref<16x128xbf16, #tpu.memory_space<vmem>>, %arg2: memref<128x16xbf16, #tpu.memory_space<vmem>>, %arg3: memref<128x1xf32, #tpu.memory_space<vmem>>, %arg4: memref<128x128xbf16, #tpu.memory_space<vmem>>, %arg5: memref<128x1xf32, #tpu.memory_space<vmem>>, %arg6: memref<128x128xbf16, #tpu.memory_space<vmem>>, %arg7: memref<128x1xf32, #tpu.memory_space<vmem>>, %arg8: memref<128x1xf32, #tpu.memory_space<vmem>>, %arg9: memref<1x1xf32, #tpu.memory_space<vmem>>, %arg10: memref<1x128xf32, #tpu.memory_space<vmem>>) attributes {dimension_semantics = [#tpu.dimension_semantics<parallel>], iteration_bounds = array<i64: 1>, scalar_prefetch = 0 : i64, scratch_operands = 0 : i64, tpu.core_type = #tpu.core_type<tc>, window_params = [{transform_indices = @transform_0, window_bounds = array<i64: 16, 128>}, {pipeline_mode = #tpu.pipeline_mode<synchronous>, transform_indices = @transform_1, window_bounds = array<i64: 128, 16>}, {pipeline_mode = #tpu.pipeline_mode<synchronous>, transform_indices = @transform_2, window_bounds = array<i64: 128, 1>}, {pipeline_mode = #tpu.pipeline_mode<synchronous>, transform_indices = @transform_3, window_bounds = array<i64: 128, 128>}, {pipeline_mode = #tpu.pipeline_mode<synchronous>, transform_indices = @transform_4, window_bounds = array<i64: 128, 1>}, {pipeline_mode = #tpu.pipeline_mode<synchronous>, transform_indices = @transform_5, window_bounds = array<i64: 128, 128>}, {pipeline_mode = #tpu.pipeline_mode<synchronous>, transform_indices = @transform_6, window_bounds = array<i64: 128, 1>}, {pipeline_mode = #tpu.pipeline_mode<synchronous>, transform_indices = @transform_7, window_bounds = array<i64: 128, 1>}, {pipeline_mode = #tpu.pipeline_mode<synchronous>, transform_indices = @transform_8, window_bounds = array<i64: 1, 1>}, {transform_indices = @transform_9, window_bounds = array<i64: 1, 128>}]} {
    %c0 = arith.constant 0 : index
    %c0_0 = arith.constant 0 : index
    %0 = vector.load %arg1[%c0, %c0_0] : memref<16x128xbf16, #tpu.memory_space<vmem>>, vector<16x128xbf16>
    %c0_1 = arith.constant 0 : index
    %c0_2 = arith.constant 0 : index
    %1 = vector.load %arg2[%c0_1, %c0_2] : memref<128x16xbf16, #tpu.memory_space<vmem>>, vector<128x16xbf16>
    %cst = arith.constant dense<0.000000e+00> : vector<128x128xf32>
    %2 = tpu.matmul %1, %0, %cst {dimension_numbers = #tpu.dot_dimension_numbers<[1], [0], [0], [1], [0, 0, 1, 1], [], []>} : vector<128x16xbf16>, vector<16x128xbf16>, vector<128x128xf32> -> vector<128x128xf32>
    %c0_3 = arith.constant 0 : index
    %c0_4 = arith.constant 0 : index
    %3 = vector.load %arg3[%c0_3, %c0_4] : memref<128x1xf32, #tpu.memory_space<vmem>>, vector<128x1xf32>
    %4 = vector.broadcast %3 : vector<128x1xf32> to vector<128x128xf32>
    %5 = arith.addf %2, %4 : vector<128x128xf32>
    %cst_5 = arith.constant 0.000000e+00 : f32
    %6 = vector.broadcast %cst_5 : f32 to vector<128x128xf32>
    %7 = arith.maximumf %5, %6 : vector<128x128xf32>
    %c0_6 = arith.constant 0 : index
    %c0_7 = arith.constant 0 : index
    %8 = vector.load %arg4[%c0_6, %c0_7] : memref<128x128xbf16, #tpu.memory_space<vmem>>, vector<128x128xbf16>
    %9 = arith.truncf %7 : vector<128x128xf32> to vector<128x128xbf16>
    %cst_8 = arith.constant dense<0.000000e+00> : vector<128x128xf32>
    %10 = tpu.matmul %8, %9, %cst_8 {dimension_numbers = #tpu.dot_dimension_numbers<[1], [0], [0], [1], [0, 0, 1, 1], [], []>} : vector<128x128xbf16>, vector<128x128xbf16>, vector<128x128xf32> -> vector<128x128xf32>
    %c0_9 = arith.constant 0 : index
    %c0_10 = arith.constant 0 : index
    %11 = vector.load %arg5[%c0_9, %c0_10] : memref<128x1xf32, #tpu.memory_space<vmem>>, vector<128x1xf32>
    %12 = vector.broadcast %11 : vector<128x1xf32> to vector<128x128xf32>
    %13 = arith.addf %10, %12 : vector<128x128xf32>
    %cst_11 = arith.constant 0.000000e+00 : f32
    %14 = vector.broadcast %cst_11 : f32 to vector<128x128xf32>
    %15 = arith.maximumf %13, %14 : vector<128x128xf32>
    %c0_12 = arith.constant 0 : index
    %c0_13 = arith.constant 0 : index
    %16 = vector.load %arg6[%c0_12, %c0_13] : memref<128x128xbf16, #tpu.memory_space<vmem>>, vector<128x128xbf16>
    %17 = arith.truncf %15 : vector<128x128xf32> to vector<128x128xbf16>
    %cst_14 = arith.constant dense<0.000000e+00> : vector<128x128xf32>
    %18 = tpu.matmul %16, %17, %cst_14 {dimension_numbers = #tpu.dot_dimension_numbers<[1], [0], [0], [1], [0, 0, 1, 1], [], []>} : vector<128x128xbf16>, vector<128x128xbf16>, vector<128x128xf32> -> vector<128x128xf32>
    %c0_15 = arith.constant 0 : index
    %c0_16 = arith.constant 0 : index
    %19 = vector.load %arg7[%c0_15, %c0_16] : memref<128x1xf32, #tpu.memory_space<vmem>>, vector<128x1xf32>
    %20 = vector.broadcast %19 : vector<128x1xf32> to vector<128x128xf32>
    %21 = arith.addf %18, %20 : vector<128x128xf32>
    %cst_17 = arith.constant 0.000000e+00 : f32
    %22 = vector.broadcast %cst_17 : f32 to vector<128x128xf32>
    %23 = arith.maximumf %21, %22 : vector<128x128xf32>
    %c0_18 = arith.constant 0 : index
    %c0_19 = arith.constant 0 : index
    %24 = vector.load %arg8[%c0_18, %c0_19] : memref<128x1xf32, #tpu.memory_space<vmem>>, vector<128x1xf32>
    %25 = vector.broadcast %24 : vector<128x1xf32> to vector<128x128xf32>
    %26 = arith.mulf %23, %25 : vector<128x128xf32>
    %cst_20 = arith.constant dense<0.000000e+00> : vector<128xf32>
    %27 = vector.multi_reduction <add>, %26, %cst_20 [0] : vector<128x128xf32> to vector<128xf32>
    %28 = vector.shape_cast %27 : vector<128xf32> to vector<1x128xf32>
    %c0_21 = arith.constant 0 : index
    %c0_22 = arith.constant 0 : index
    %29 = vector.load %arg9[%c0_21, %c0_22] : memref<1x1xf32, #tpu.memory_space<vmem>>, vector<1x1xf32>
    %30 = vector.broadcast %29 : vector<1x1xf32> to vector<1x128xf32>
    %31 = arith.addf %28, %30 : vector<1x128xf32>
    %c0_23 = arith.constant 0 : index
    %c0_24 = arith.constant 0 : index
    %32 = vector.load %arg10[%c0_23, %c0_24] : memref<1x128xf32, #tpu.memory_space<vmem>>, vector<1x128xf32>
    tpu.vector_store %arg10[%c0_23, %c0_24], %31 {strides = array<i32>} : memref<1x128xf32, #tpu.memory_space<vmem>>, vector<1x128xf32>,
    return
  }
  func.func @transform_0(%arg0: i32) -> (i32, i32) {
    %c0_i32 = arith.constant 0 : i32
    %c0_i32_0 = arith.constant 0 : i32
    return %c0_i32, %arg0 : i32, i32
  }
  func.func @transform_1(%arg0: i32) -> (i32, i32) {
    %c0_i32 = arith.constant 0 : i32
    %c0_i32_0 = arith.constant 0 : i32
    %c0_i32_1 = arith.constant 0 : i32
    return %c0_i32, %c0_i32_0 : i32, i32
  }
  func.func @transform_2(%arg0: i32) -> (i32, i32) {
    %c0_i32 = arith.constant 0 : i32
    %c0_i32_0 = arith.constant 0 : i32
    %c0_i32_1 = arith.constant 0 : i32
    return %c0_i32, %c0_i32_0 : i32, i32
  }
  func.func @transform_3(%arg0: i32) -> (i32, i32) {
    %c0_i32 = arith.constant 0 : i32
    %c0_i32_0 = arith.constant 0 : i32
    %c0_i32_1 = arith.constant 0 : i32
    return %c0_i32, %c0_i32_0 : i32, i32
  }
  func.func @transform_4(%arg0: i32) -> (i32, i32) {
    %c0_i32 = arith.constant 0 : i32
    %c0_i32_0 = arith.constant 0 : i32
    %c0_i32_1 = arith.constant 0 : i32
    return %c0_i32, %c0_i32_0 : i32, i32
  }
  func.func @transform_5(%arg0: i32) -> (i32, i32) {
    %c0_i32 = arith.constant 0 : i32
    %c0_i32_0 = arith.constant 0 : i32
    %c0_i32_1 = arith.constant 0 : i32
    return %c0_i32, %c0_i32_0 : i32, i32
  }
  func.func @transform_6(%arg0: i32) -> (i32, i32) {
    %c0_i32 = arith.constant 0 : i32
    %c0_i32_0 = arith.constant 0 : i32
    %c0_i32_1 = arith.constant 0 : i32
    return %c0_i32, %c0_i32_0 : i32, i32
  }
  func.func @transform_7(%arg0: i32) -> (i32, i32) {
    %c0_i32 = arith.constant 0 : i32
    %c0_i32_0 = arith.constant 0 : i32
    %c0_i32_1 = arith.constant 0 : i32
    return %c0_i32, %c0_i32_0 : i32, i32
  }
  func.func @transform_8(%arg0: i32) -> (i32, i32) {
    %c0_i32 = arith.constant 0 : i32
    %c0_i32_0 = arith.constant 0 : i32
    %c0_i32_1 = arith.constant 0 : i32
    return %c0_i32, %c0_i32_0 : i32, i32
  }
  func.func @transform_9(%arg0: i32) -> (i32, i32) {
    %c0_i32 = arith.constant 0 : i32
    %c0_i32_0 = arith.constant 0 : i32
    return %c0_i32, %arg0 : i32, i32
  }
}

</mosaic_0001>

<bundles_post_ra>
// kernel: tpu_custom_call.1
= control target key start
LH: loop header
LB: loop body
LE: loop exit
PB: predicated region body
PF: predicated region fallthrough
CT: control target
= control target key end

     0   :  { %s1613_s0 = inlined_call_operand.vmem [shape: bf16[16,128], index: 0, kind: input, shape index: {}]   ;;  %s1614_s1 = inlined_call_operand.vmem [shape: bf16[128,16], index: 1, kind: input, shape index: {}]   ;;  %s1615_s2 = inlined_call_operand.vmem [shape: f32[128,1], index: 2, kind: input, shape index: {}]   ;;  %s1616_s3 = inlined_call_operand.vmem [shape: bf16[128,128], index: 3, kind: input, shape index: {}]   ;;  %s1617_s4 = inlined_call_operand.vmem [shape: f32[128,1], index: 4, kind: input, shape index: {}]   ;;  %s1618_s5 = inlined_call_operand.vmem [shape: bf16[128,128], index: 5, kind: input, shape index: {}]   ;;  %s1619_s6 = inlined_call_operand.vmem [shape: f32[128,1], index: 6, kind: input, shape index: {}]   ;;  %s1620_s7 = inlined_call_operand.vmem [shape: f32[128,1], index: 7, kind: input, shape index: {}]   ;;  %s1621_s8 = inlined_call_operand.<no memory space> [shape: f32[1,1], index: 8, kind: input, shape index: {}]   ;;  %s1622_s9 = inlined_call_operand.hbm [shape: f32[1,128], index: 9, kind: output, shape index: {}]  }
   0x1   :  { %v14_v0 = vstv %s1621_s8 }
   0x2   :  { %15 = vst [vmem:[#allocation2] sm:$0x1] %v14_v0 }
   0x3   :  { %v68_v1 = vld [vmem:[%s1615_s2 + $0x70] sm:$0xff]  ;;  %v66_v2 = vld [vmem:[%s1615_s2 + $0x60] sm:$0xff]  ;;  %v1262_v3 = vmov 0   ;;  %v69_v5 = vld [vmem:[%s1615_s2 + $0x78] sm:$0xff]  ;;  %vm196_vm0 = vcmask 130048  }
   0x4   :  { %1214 = vset.pattern.permute.xlu1 %v1262_v3  ;;  %1213 = vset.pattern.permute.xlu0 %v1262_v3  ;;  %v1215_v4 = vld [vmem:[%s1613_s0] sm:$0xff]   ;;  %v67_v6 = vld [vmem:[%s1615_s2 + $0x68] sm:$0xff]  ;;  %v1218_v9 = vld [vmem:[%s1614_s1 + $0x10] sm:$0xff]  }
   0x5   :  { %142 = vperm.xlu0 %1213, %v68_v1   ;;  %132 = vperm.xlu1 %1214, %v66_v2   ;;  %v1216_v7 = vld [vmem:[%s1614_s1] sm:$0xff]   ;;  %v1217_v8 = vld [vmem:[%s1614_s1 + $0x8] sm:$0xff]   ;;  %v65_v10 = vld [vmem:[%s1615_s2 + $0x58] sm:$0xff] }
   0x6   :  { %1129 = vmatprep.subr.bf16.mxu0 %v1215_v4  ;;  %1131 = vmatprep.mubr.msk.bf16.mxu0 %vm196_vm0, %v1216_v7  ;;  %v64_v11 = vld [vmem:[%s1615_s2 + $0x50] sm:$0xff]  ;;  %v63_v12 = vld [vmem:[%s1615_s2 + $0x48] sm:$0xff]  ;;  %v62_v13 = vld [vmem:[%s1615_s2 + $0x40] sm:$0xff] }
   0x7   :  { %1130 = vmatpush3.bf16.msra.mxu0 %v1215_v4  ;;  %v1219_v14 = vld [vmem:[%s1614_s1 + $0x18] sm:$0xff]   ;;  %v1220_v15 = vld [vmem:[%s1614_s1 + $0x20] sm:$0xff]   ;;  %v60_v17 = vld [vmem:[%s1615_s2 + $0x30] sm:$0xff] }
   0x8   :  { %v61_v16 = vld [vmem:[%s1615_s2 + $0x38] sm:$0xff]  ;;  %v59_v18 = vld [vmem:[%s1615_s2 + $0x28] sm:$0xff]  ;;  %v58_v19 = vld [vmem:[%s1615_s2 + $0x20] sm:$0xff] }
   0x9   :  { %147 = vperm.xlu0 %1213, %v69_v5   ;;  %137 = vperm.xlu1 %1214, %v67_v6   ;;  %v1221_v20 = vld [vmem:[%s1614_s1 + $0x28] sm:$0xff]   ;;  %v1222_v21 = vld [vmem:[%s1614_s1 + $0x30] sm:$0xff]   ;;  %v57_v22 = vld [vmem:[%s1615_s2 + $0x18] sm:$0xff] }
   0xa   :  { %1132 = vmatmul.mubr.msk.bf16.vlgmr.msra.gmra.mxu0 %vm196_vm0, %v1217_v8  ;;  %v56_v23 = vld [vmem:[%s1615_s2 + $0x10] sm:$0xff]  ;;  %v55_v24 = vld [vmem:[%s1615_s2 + $0x8] sm:$0xff]  ;;  %v54_v25 = vld [vmem:[%s1615_s2] sm:$0xff] }
   0xb   :  { %1135 = vmatprep.mubr.msk.bf16.mxu0 %vm196_vm0, %v1218_v9  ;;  %v1223_v26 = vld [vmem:[%s1614_s1 + $0x38] sm:$0xff]   ;;  %v372_v28 = vld [vmem:[%s1617_s4 + $0x70] sm:$0xff]  ;;  %v371_v29 = vld [vmem:[%s1617_s4 + $0x68] sm:$0xff] }
   0xc   :  { %v373_v27 = vld [vmem:[%s1617_s4 + $0x78] sm:$0xff]  ;;  %v370_v30 = vld [vmem:[%s1617_s4 + $0x60] sm:$0xff]  ;;  %v368_v32 = vld [vmem:[%s1617_s4 + $0x50] sm:$0xff] }
   0xd   :  { %127 = vperm.xlu1 %1214, %v65_v10   ;;  %122 = vperm.xlu0 %1213, %v64_v11   ;;  %v369_v31 = vld [vmem:[%s1617_s4 + $0x58] sm:$0xff] }
  0x11   :  { %117 = vperm.xlu1 %1214, %v63_v12   ;;  %112 = vperm.xlu0 %1213, %v62_v13  }
  0x12   :  { %1136 = vmatmul.mubr.msk.bf16.gmra.mxu0 %vm196_vm0, %v1219_v14 }
  0x13   :  { %1139 = vmatprep.mubr.msk.bf16.mxu0 %vm196_vm0, %v1220_v15 }
  0x15   :  { %107 = vperm.xlu1 %1214, %v61_v16   ;;  %102 = vperm.xlu0 %1213, %v60_v17  }
  0x19   :  { %97 = vperm.xlu1 %1214, %v59_v18   ;;  %92 = vperm.xlu0 %1213, %v58_v19  }
  0x1a   :  { %1140 = vmatmul.mubr.msk.bf16.gmra.mxu0 %vm196_vm0, %v1221_v20 }
  0x1b   :  { %1143 = vmatprep.mubr.msk.bf16.mxu0 %vm196_vm0, %v1222_v21 }
  0x1d   :  { %87 = vperm.xlu1 %1214, %v57_v22   ;;  %82 = vperm.xlu0 %1213, %v56_v23  }
  0x21   :  { %77 = vperm.xlu1 %1214, %v55_v24   ;;  %72 = vperm.xlu0 %1213, %v54_v25  }
  0x22   :  { %1144 = vmatmul.mubr.msk.bf16.gmra.mxu0 %vm196_vm0, %v1223_v26 }
  0x25   :  { %451 = vperm.xlu1 %1214, %v373_v27   ;;  %446 = vperm.xlu0 %1213, %v372_v28  }
  0x29   :  { %441 = vperm.xlu1 %1214, %v371_v29   ;;  %436 = vperm.xlu0 %1213, %v370_v30  }
  0x2a   :  { %16 = vsyncpa [#allocation4], 0  ;;  %v367_v33 = vld [vmem:[%s1617_s4 + $0x48] sm:$0xff]  ;;  %v366_v34 = vld [vmem:[%s1617_s4 + $0x40] sm:$0xff] }
  0x2b   :  { %v365_v35 = vld [vmem:[%s1617_s4 + $0x38] sm:$0xff]  ;;  %v364_v36 = vld [vmem:[%s1617_s4 + $0x30] sm:$0xff]  ;;  %v363_v37 = vld [vmem:[%s1617_s4 + $0x28] sm:$0xff] }
  0x2c   :  { %v362_v38 = vld [vmem:[%s1617_s4 + $0x20] sm:$0xff]  ;;  %v361_v39 = vld [vmem:[%s1617_s4 + $0x18] sm:$0xff]  ;;  %v360_v40 = vld [vmem:[%s1617_s4 + $0x10] sm:$0xff] }
  0x2d   :  { %431 = vperm.xlu1 %1214, %v369_v31   ;;  %426 = vperm.xlu0 %1213, %v368_v32   ;;  %v359_v41 = vld [vmem:[%s1617_s4 + $0x8] sm:$0xff]  ;;  %v358_v42 = vld [vmem:[%s1617_s4] sm:$0xff]  ;;  %v642_v45 = vld [vmem:[%s1619_s6 + $0x18] sm:$0xff] }
  0x2e   :  { %v640_v43 = vld [vmem:[%s1619_s6 + $0x8] sm:$0xff]  ;;  %v639_v44 = vld [vmem:[%s1619_s6] sm:$0xff]  ;;  %v641_v46 = vld [vmem:[%s1619_s6 + $0x10] sm:$0xff] }
  0x2f   :  { %v644_v47 = vld [vmem:[%s1619_s6 + $0x28] sm:$0xff]  ;;  %v643_v48 = vld [vmem:[%s1619_s6 + $0x20] sm:$0xff]  ;;  %v899_v51 = vld [vmem:[%s1620_s7 + $0x18] sm:$0xff] }
  0x30   :  { %v897_v49 = vld [vmem:[%s1620_s7 + $0x8] sm:$0xff]  ;;  %v896_v50 = vld [vmem:[%s1620_s7] sm:$0xff]  ;;  %v898_v52 = vld [vmem:[%s1620_s7 + $0x10] sm:$0xff] }
  0x31   :  { %421 = vperm.xlu1 %1214, %v367_v33   ;;  %416 = vperm.xlu0 %1213, %v366_v34   ;;  %v900_v53 = vld [vmem:[%s1620_s7 + $0x20] sm:$0xff]  ;;  %v645_v54 = vld [vmem:[%s1619_s6 + $0x30] sm:$0xff]  ;;  %v901_v55 = vld [vmem:[%s1620_s7 + $0x28] sm:$0xff] }
  0x32   :  { %v646_v56 = vld [vmem:[%s1619_s6 + $0x38] sm:$0xff]  ;;  %v902_v57 = vld [vmem:[%s1620_s7 + $0x30] sm:$0xff]  ;;  %v647_v58 = vld [vmem:[%s1619_s6 + $0x40] sm:$0xff] }
  0x33   :  { %v903_v59 = vld [vmem:[%s1620_s7 + $0x38] sm:$0xff]  ;;  %v648_v60 = vld [vmem:[%s1619_s6 + $0x48] sm:$0xff]  ;;  %v904_v61 = vld [vmem:[%s1620_s7 + $0x40] sm:$0xff] }
  0x34   :  { %v649_v62 = vld [vmem:[%s1619_s6 + $0x50] sm:$0xff]  ;;  %v905_v63 = vld [vmem:[%s1620_s7 + $0x48] sm:$0xff]  ;;  %v650_v0 = vld [vmem:[%s1619_s6 + $0x58] sm:$0xff] }
  0x35   :  { %411 = vperm.xlu1 %1214, %v365_v35   ;;  %406 = vperm.xlu0 %1213, %v364_v36   ;;  %v906_v1 = vld [vmem:[%s1620_s7 + $0x50] sm:$0xff]  ;;  %v651_v2 = vld [vmem:[%s1619_s6 + $0x60] sm:$0xff]  ;;  %v907_v3 = vld [vmem:[%s1620_s7 + $0x58] sm:$0xff] }
  0x36   :  { %v652_v4 = vld [vmem:[%s1619_s6 + $0x68] sm:$0xff]  ;;  %v908_v5 = vld [vmem:[%s1620_s7 + $0x60] sm:$0xff]  ;;  %v653_v6 = vld [vmem:[%s1619_s6 + $0x70] sm:$0xff] }
  0x37   :  { %v909_v7 = vld [vmem:[%s1620_s7 + $0x68] sm:$0xff]  ;;  %v654_v8 = vld [vmem:[%s1619_s6 + $0x78] sm:$0xff]  ;;  %v910_v10 = vld [vmem:[%s1620_s7 + $0x70] sm:$0xff] }
  0x38   :  { %v911_v9 = vld [vmem:[%s1620_s7 + $0x78] sm:$0xff]  ;;  %v1029_v11 = vld [vmem:[#allocation2] sm:$0x1] }
  0x39   :  { %401 = vperm.xlu1 %1214, %v363_v37   ;;  %396 = vperm.xlu0 %1213, %v362_v38   ;;  %v1224_v12 = vld [vmem:[%s1616_s3] sm:$0xff]  }
  0x3a   :  { %1163 = vmatprep.mubr.bf16.mxu1 %v1224_v12 }
  0x3d   :  { %391 = vperm.xlu1 %1214, %v361_v39   ;;  %386 = vperm.xlu0 %1213, %v360_v40  }
  0x41   :  { %381 = vperm.xlu1 %1214, %v359_v41   ;;  %376 = vperm.xlu0 %1213, %v358_v42  }
  0x45   :  { %662 = vperm.xlu1 %1214, %v640_v43   ;;  %657 = vperm.xlu0 %1213, %v639_v44  }
  0x49   :  { %672 = vperm.xlu1 %1214, %v642_v45   ;;  %667 = vperm.xlu0 %1213, %v641_v46  }
  0x4d   :  { %682 = vperm.xlu1 %1214, %v644_v47   ;;  %677 = vperm.xlu0 %1213, %v643_v48  }
  0x51   :  { %919 = vperm.xlu1 %1214, %v897_v49   ;;  %914 = vperm.xlu0 %1213, %v896_v50  }
  0x55   :  { %929 = vperm.xlu1 %1214, %v899_v51   ;;  %924 = vperm.xlu0 %1213, %v898_v52  }
  0x59   :  { %934 = vperm.xlu1 %1214, %v900_v53   ;;  %687 = vperm.xlu0 %1213, %v645_v54  }
  0x5d   :  { %939 = vperm.xlu1 %1214, %v901_v55   ;;  %692 = vperm.xlu0 %1213, %v646_v56  }
  0x61   :  { %944 = vperm.xlu1 %1214, %v902_v57   ;;  %697 = vperm.xlu0 %1213, %v647_v58  }
  0x65   :  { %949 = vperm.xlu1 %1214, %v903_v59   ;;  %702 = vperm.xlu0 %1213, %v648_v60  }
  0x69   :  { %954 = vperm.xlu1 %1214, %v904_v61   ;;  %707 = vperm.xlu0 %1213, %v649_v62  }
  0x6d   :  { %959 = vperm.xlu1 %1214, %v905_v63   ;;  %712 = vperm.xlu0 %1213, %v650_v0  }
  0x71   :  { %964 = vperm.xlu1 %1214, %v906_v1   ;;  %717 = vperm.xlu0 %1213, %v651_v2  }
  0x75   :  { %969 = vperm.xlu1 %1214, %v907_v3   ;;  %722 = vperm.xlu0 %1213, %v652_v4  }
  0x79   :  { %974 = vperm.xlu1 %1214, %v908_v5   ;;  %727 = vperm.xlu0 %1213, %v653_v6  }
  0x7d   :  { %979 = vperm.xlu1 %1214, %v909_v7   ;;  %732 = vperm.xlu0 %1213, %v654_v8  }
  0x80   :  { %v133_v17 = vpop.permute.xlu1 %132  ;;  %v143_v19 = vpop.permute.xlu0 %142 }
  0x81   :  { %989 = vperm.xlu1 %1214, %v911_v9   ;;  %984 = vperm.xlu0 %1213, %v910_v10  }
  0x84   :  { %v138_v22 = vpop.permute.xlu1 %137  ;;  %v148_v24 = vpop.permute.xlu0 %147 }
  0x85   :  { %1032 = vperm.xlu0 %1213, %v1029_v11  }
  0x88   :  { %v128_v27 = vpop.permute.xlu1 %127  ;;  %v123_v29 = vpop.permute.xlu0 %122 }
  0x8c   :  { %v118_v32 = vpop.permute.xlu1 %117  ;;  %v113_v35 = vpop.permute.xlu0 %112 }
  0x90   :  { %v108_v44 = vpop.permute.xlu1 %107  ;;  %v103_v49 = vpop.permute.xlu0 %102 }
  0x94   :  { %v98_v55 = vpop.permute.xlu1 %97  ;;  %v93_v59 = vpop.permute.xlu0 %92 }
  0x98   :  { %v88_v1 = vpop.permute.xlu1 %87  ;;  %v83_v4 = vpop.permute.xlu0 %82 }
  0x9c   :  { %v78_v10 = vpop.permute.xlu1 %77 }
  0xca   :  { %v1547_v13 = vpop.f32.mrf.mxu0 }
  0xcb   :  { %v264_v8 = vadd.f32 %v1547_v13, %v83_v4  ;;  %v1225_v13 = vld [vmem:[%s1616_s3 + $0x8] sm:$0xff]  }
  0xcc   :  { %v1549_v14 = vpop.f32.mrf.mxu0 }
  0xce   :  { %v1134_v15 = vpop.f32.mrf.mxu0 }
  0xcf   :  { %v267_v5 = vadd.f32 %v1134_v15, %v88_v1 }
  0xd0   :  { %v1551_v16 = vpop.f32.mrf.mxu0 }
  0xd1   :  { %v321_v11 = vmax.f32 %v267_v5, 0.0  ;;  %v259_v12 = vadd.f32 %v1551_v16, %v78_v10  ;;  %v1226_v16 = vld [vmem:[%s1616_s3 + $0x10] sm:$0xff]  }
  0xd2   :  { %v1137_v18 = vpop.f32.mrf.mxu0 }
  0xd3   :  { %v280_v60 = vadd.f32 %v1137_v18, %v103_v49  ;;  %v73_v18 = vpop.permute.xlu0 %72  ;;  %v319_v15 = vmax.f32 %v259_v12, 0.0 }
  0xd4   :  { %v271_v20 = vpop.f32.mrf.mxu0 }
  0xd5   :  { %v324_v2 = vmax.f32 %v280_v60, 0.0  ;;  %v272_v3 = vadd.f32 %v271_v20, %v93_v59  ;;  %v256_v20 = vadd.f32 %v1549_v14, %v73_v18  ;;  %v1227_v14 = vld [vmem:[%s1616_s3 + $0x18] sm:$0xff]  }
  0xd6   :  { %v1138_v21 = vpop.f32.mrf.mxu0 }
  0xd7   :  { %v283_v56 = vadd.f32 %v1138_v21, %v108_v44  ;;  %v322_v9 = vmax.f32 %v272_v3, 0.0 }
  0xd8   :  { %v274_v23 = vpop.f32.mrf.mxu0 }
  0xd9   :  { %v325_v62 = vmax.f32 %v283_v56, 0.0  ;;  %v275_v63 = vadd.f32 %v274_v23, %v98_v55 }
  0xda   :  { %v1141_v25 = vpop.f32.mrf.mxu0 }
  0xdb   :  { %v296_v45 = vadd.f32 %v1141_v25, %v123_v29  ;;  %v353_v6 = vpack.c.bf16 %v325_v62, %v324_v2  ;;  %v323_v7 = vmax.f32 %v275_v63, 0.0  ;;  %v1229_v25 = vld [vmem:[%s1616_s3 + $0x28] sm:$0xff]  }
  0xdc   :  { %v287_v26 = vpop.f32.mrf.mxu0 }
  0xdd   :  { %v328_v53 = vmax.f32 %v296_v45, 0.0  ;;  %v288_v54 = vadd.f32 %v287_v26, %v113_v35  ;;  %v1230_v26 = vld [vmem:[%s1616_s3 + $0x30] sm:$0xff]   ;;  %v447_v35 = vpop.permute.xlu0 %446 }
  0xde   :  { %v1142_v28 = vpop.f32.mrf.mxu0 }
  0xdf   :  { %v299_v40 = vadd.f32 %v1142_v28, %v128_v27  ;;  %v326_v61 = vmax.f32 %v288_v54, 0.0  ;;  %v1231_v27 = vld [vmem:[%s1616_s3 + $0x38] sm:$0xff]   ;;  %v1232_v28 = vld [vmem:[%s1618_s5] sm:$0xff]  }
  0xe0   :  { %v290_v30 = vpop.f32.mrf.mxu0  ;;  %1195 = vmatprep.mubr.bf16.mxu0 %v1232_v28 }
  0xe1   :  { %v329_v50 = vmax.f32 %v299_v40, 0.0  ;;  %v291_v51 = vadd.f32 %v290_v30, %v118_v32  ;;  %v437_v40 = vpop.permute.xlu0 %436 }
  0xe2   :  { %v1145_v31 = vpop.f32.mrf.mxu0 }
  0xe3   :  { %v312_v34 = vadd.f32 %v1145_v31, %v143_v19  ;;  %v355_v57 = vpack.c.bf16 %v329_v50, %v328_v53  ;;  %v327_v58 = vmax.f32 %v291_v51, 0.0  ;;  %v320_v19 = vmax.f32 %v264_v8, 0.0 }
  0xe4   :  { %v303_v33 = vpop.f32.mrf.mxu0 }
  0xe5   :  { %v304_v37 = vadd.f32 %v303_v33, %v133_v17  ;;  %v332_v41 = vmax.f32 %v312_v34, 0.0  ;;  %v354_v0 = vpack.c.bf16 %v327_v58, %v326_v61  ;;  %v352_v17 = vpack.c.bf16 %v323_v7, %v322_v9  ;;  %v452_v33 = vpop.permute.xlu1 %451  ;;  %v427_v45 = vpop.permute.xlu0 %426 }
  0xe6   :  { %v1146_v36 = vpop.f32.mrf.mxu0  ;;  %v351_v21 = vpack.c.bf16 %v321_v11, %v320_v19 }
  0xe7   :  { %v315_v38 = vadd.f32 %v1146_v36, %v148_v24  ;;  %v330_v46 = vmax.f32 %v304_v37, 0.0  ;;  %v1228_v24 = vld [vmem:[%s1616_s3 + $0x20] sm:$0xff]  }
  0xe8   :  { %v306_v39 = vpop.f32.mrf.mxu0 }
  0xe9   :  { %v333_v42 = vmax.f32 %v315_v38, 0.0  ;;  %v307_v43 = vadd.f32 %v306_v39, %v138_v22  ;;  %v318_v22 = vmax.f32 %v256_v20, 0.0  ;;  %v442_v38 = vpop.permute.xlu1 %441  ;;  %v417_v51 = vpop.permute.xlu0 %416 }
  0xeb   :  { %v331_v47 = vmax.f32 %v307_v43, 0.0  ;;  %v357_v48 = vpack.c.bf16 %v333_v42, %v332_v41  ;;  %v350_v23 = vpack.c.bf16 %v319_v15, %v318_v22 }
  0xed   :  { %v356_v52 = vpack.c.bf16 %v331_v47, %v330_v46  ;;  %1147 = vmatprep.subr.bf16.mxu1 %v357_v48  ;;  %v432_v43 = vpop.permute.xlu1 %431  ;;  %v407_v1 = vpop.permute.xlu0 %406 }
  0xee   :  { %1148 = vmatpush3.bf16.msra.mxu1 %v357_v48 }
  0xef   :  { %1149 = vmatprep.subr.bf16.mxu1 %v356_v52 }
  0xf1   :  { %v422_v48 = vpop.permute.xlu1 %421  ;;  %v397_v11 = vpop.permute.xlu0 %396 }
  0xf2   :  { %1150 = vmatpush3.bf16.msra.mxu1 %v356_v52 }
  0xf3   :  { %1151 = vmatprep.subr.bf16.mxu1 %v355_v57 }
  0xf5   :  { %v412_v60 = vpop.permute.xlu1 %411 }
  0xf6   :  { %1152 = vmatpush3.bf16.msra.mxu1 %v355_v57 }
  0xf7   :  { %1153 = vmatprep.subr.bf16.mxu1 %v354_v0 }
  0xf9   :  { %v402_v7 = vpop.permute.xlu1 %401 }
  0xfa   :  { %1154 = vmatpush3.bf16.msra.mxu1 %v354_v0 }
  0xfb   :  { %1155 = vmatprep.subr.bf16.mxu1 %v353_v6 }
  0xfe   :  { %1156 = vmatpush3.bf16.msra.mxu1 %v353_v6 }
  0xff   :  { %1157 = vmatprep.subr.bf16.mxu1 %v352_v17 }
 0x102   :  { %1158 = vmatpush3.bf16.msra.mxu1 %v352_v17 }
 0x103   :  { %1159 = vmatprep.subr.bf16.mxu1 %v351_v21 }
 0x106   :  { %1160 = vmatpush3.bf16.msra.mxu1 %v351_v21  ;;  %v392_v21 = vpop.permute.xlu1 %391 }
 0x107   :  { %1161 = vmatprep.subr.bf16.mxu1 %v350_v23 }
 0x10a   :  { %1162 = vmatpush3.bf16.msra.mxu1 %v350_v23  ;;  %v387_v23 = vpop.permute.xlu0 %386 }
 0x10d   :  { %1164 = vmatmul.mubr.bf16.vlgmr.msra.gmra.mxu1 %v1225_v13 }
 0x10e   :  { %1167 = vmatprep.mubr.bf16.mxu1 %v1226_v16 }
 0x115   :  { %1168 = vmatmul.mubr.bf16.gmra.mxu1 %v1227_v14 }
 0x116   :  { %1171 = vmatprep.mubr.bf16.mxu1 %v1228_v24 }
 0x11d   :  { %1172 = vmatmul.mubr.bf16.gmra.mxu1 %v1229_v25 }
 0x11e   :  { %1175 = vmatprep.mubr.bf16.mxu1 %v1230_v26  ;;  %v382_v26 = vpop.permute.xlu1 %381 }
 0x125   :  { %1176 = vmatmul.mubr.bf16.gmra.mxu1 %v1231_v27 }
 0x1cd   :  { %v1580_v29 = vpop.f32.mrf.mxu1 }
 0x1ce   :  { %v545_v24 = vadd.f32 %v1580_v29, %v387_v23  ;;  %v1233_v29 = vld [vmem:[%s1618_s5 + $0x8] sm:$0xff]  }
 0x1cf   :  { %v1582_v30 = vpop.f32.mrf.mxu1 }
 0x1d1   :  { %v1166_v31 = vpop.f32.mrf.mxu1 }
 0x1d2   :  { %v548_v13 = vadd.f32 %v1166_v31, %v392_v21 }
 0x1d3   :  { %v1584_v32 = vpop.f32.mrf.mxu1 }
 0x1d4   :  { %v602_v27 = vmax.f32 %v548_v13, 0.0  ;;  %v540_v28 = vadd.f32 %v1584_v32, %v382_v26  ;;  %v1234_v32 = vld [vmem:[%s1618_s5 + $0x10] sm:$0xff]  }
 0x1d5   :  { %v1169_v34 = vpop.f32.mrf.mxu1 }
 0x1d6   :  { %v561_v12 = vadd.f32 %v1169_v34, %v407_v1  ;;  %v377_v34 = vpop.permute.xlu0 %376  ;;  %v600_v31 = vmax.f32 %v540_v28, 0.0 }
 0x1d7   :  { %v552_v36 = vpop.f32.mrf.mxu1 }
 0x1d8   :  { %v605_v15 = vmax.f32 %v561_v12, 0.0  ;;  %v553_v22 = vadd.f32 %v552_v36, %v397_v11  ;;  %v537_v36 = vadd.f32 %v1582_v30, %v377_v34  ;;  %v1235_v30 = vld [vmem:[%s1618_s5 + $0x18] sm:$0xff]  }
 0x1d9   :  { %v1170_v37 = vpop.f32.mrf.mxu1 }
 0x1da   :  { %v564_v8 = vadd.f32 %v1170_v37, %v412_v60  ;;  %v603_v25 = vmax.f32 %v553_v22, 0.0 }
 0x1db   :  { %v555_v39 = vpop.f32.mrf.mxu1 }
 0x1dc   :  { %v606_v18 = vmax.f32 %v564_v8, 0.0  ;;  %v556_v19 = vadd.f32 %v555_v39, %v402_v7 }
 0x1dd   :  { %v1173_v41 = vpop.f32.mrf.mxu1 }
 0x1de   :  { %v577_v61 = vadd.f32 %v1173_v41, %v427_v45  ;;  %v634_v16 = vpack.c.bf16 %v606_v18, %v605_v15  ;;  %v604_v14 = vmax.f32 %v556_v19, 0.0  ;;  %v1237_v41 = vld [vmem:[%s1618_s5 + $0x28] sm:$0xff]   ;;  %v663_v45 = vpop.permute.xlu1 %662 }
 0x1df   :  { %v568_v42 = vpop.f32.mrf.mxu1 }
 0x1e0   :  { %v609_v5 = vmax.f32 %v577_v61, 0.0  ;;  %v569_v6 = vadd.f32 %v568_v42, %v417_v51  ;;  %v1238_v42 = vld [vmem:[%s1618_s5 + $0x30] sm:$0xff]  }
 0x1e1   :  { %v1174_v44 = vpop.f32.mrf.mxu1 }
 0x1e2   :  { %v580_v56 = vadd.f32 %v1174_v44, %v432_v43  ;;  %v607_v17 = vmax.f32 %v569_v6, 0.0  ;;  %v1239_v43 = vld [vmem:[%s1618_s5 + $0x38] sm:$0xff]   ;;  %v658_v44 = vpop.permute.xlu0 %657 }
 0x1e3   :  { %v571_v46 = vpop.f32.mrf.mxu1 }
 0x1e4   :  { %v610_v2 = vmax.f32 %v580_v56, 0.0  ;;  %v572_v3 = vadd.f32 %v571_v46, %v422_v48 }
 0x1e5   :  { %v1177_v47 = vpop.f32.mrf.mxu1 }
 0x1e6   :  { %v593_v50 = vadd.f32 %v1177_v47, %v447_v35  ;;  %v636_v9 = vpack.c.bf16 %v610_v2, %v609_v5  ;;  %v608_v10 = vmax.f32 %v572_v3, 0.0  ;;  %v601_v35 = vmax.f32 %v545_v24, 0.0  ;;  %v668_v46 = vpop.permute.xlu0 %667  ;;  %v673_v47 = vpop.permute.xlu1 %672 }
 0x1e7   :  { %v584_v49 = vpop.f32.mrf.mxu1 }
 0x1e8   :  { %v585_v53 = vadd.f32 %v584_v49, %v437_v40  ;;  %v613_v57 = vmax.f32 %v593_v50, 0.0  ;;  %v635_v20 = vpack.c.bf16 %v608_v10, %v607_v17  ;;  %v632_v37 = vpack.c.bf16 %v602_v27, %v601_v35  ;;  %v1236_v40 = vld [vmem:[%s1618_s5 + $0x20] sm:$0xff]   ;;  %s1263_s5 = smov [#allocation3]  }
 0x1e9   :  { %v1178_v52 = vpop.f32.mrf.mxu1  ;;  %s1047_s7 = sshll.u32 %s1263_s5, 4  ;;  %s1048_s7 = int_to_ptr.vmem [resolvable:$true] %s1047_s7 }
 0x1ea   :  { %v596_v54 = vadd.f32 %v1178_v52, %v452_v33  ;;  %v611_v62 = vmax.f32 %v585_v53, 0.0  ;;  %v633_v33 = vpack.c.bf16 %v604_v14, %v603_v25  ;;  %v678_v48 = vpop.permute.xlu0 %677  ;;  %v683_v49 = vpop.permute.xlu1 %682  ;;  %s1240_s10 = scalar_lea.vmem %s1048_s7, 16  ;;  %s1244_s11 = scalar_lea.vmem %s1048_s7, 32 }
 0x1eb   :  { %v587_v55 = vpop.f32.mrf.mxu1  ;;  %p1241_p0 = scmp.ne.s32.totalorder %s1048_s7, %s1240_s10  ;;  %p1245_p1 = scmp.lt.s32.totalorder %s1048_s7, %s1048_s7 }
 0x1ec   :  { %v614_v58 = vmax.f32 %v596_v54, 0.0  ;;  %v588_v59 = vadd.f32 %v587_v55, %v442_v38  ;;  %v599_v38 = vmax.f32 %v537_v36, 0.0  ;;  %p1246_p2 = scmp.lt.s32.totalorder %s1244_s11, %s1240_s10 }
 0x1ee   :  { %v638_v63 = vpack.c.bf16 %v614_v58, %v613_v57  ;;  %v612_v0 = vmax.f32 %v588_v59, 0.0  ;;  %v631_v39 = vpack.c.bf16 %v600_v31, %v599_v38  ;;  %v915_v50 = vpop.permute.xlu0 %914  ;;  %v920_v51 = vpop.permute.xlu1 %919  ;;  %p1247_p3 = por %p1246_p2, %p1245_p1 }
 0x1f0   :  { %v637_v4 = vpack.c.bf16 %v612_v0, %v611_v62  ;;  %1179 = vmatprep.subr.bf16.mxu0 %v638_v63  ;;  %p1248_p4 = pnand %p1247_p3, %p1241_p0 }
 0x1f1   :  { %1180 = vmatpush3.bf16.msra.mxu0 %v638_v63 }
 0x1f2   :  { %1181 = vmatprep.subr.bf16.mxu0 %v637_v4  ;;  %v925_v52 = vpop.permute.xlu0 %924  ;;  %v930_v53 = vpop.permute.xlu1 %929 }
 0x1f5   :  { %1182 = vmatpush3.bf16.msra.mxu0 %v637_v4 }
 0x1f6   :  { %1183 = vmatprep.subr.bf16.mxu0 %v636_v9  ;;  %v688_v54 = vpop.permute.xlu0 %687  ;;  %v935_v55 = vpop.permute.xlu1 %934 }
 0x1f9   :  { %1184 = vmatpush3.bf16.msra.mxu0 %v636_v9 }
 0x1fa   :  { %1185 = vmatprep.subr.bf16.mxu0 %v635_v20  ;;  %v693_v56 = vpop.permute.xlu0 %692  ;;  %v940_v57 = vpop.permute.xlu1 %939 }
 0x1fd   :  { %1186 = vmatpush3.bf16.msra.mxu0 %v635_v20 }
 0x1fe   :  { %1187 = vmatprep.subr.bf16.mxu0 %v634_v16  ;;  %v698_v58 = vpop.permute.xlu0 %697  ;;  %v945_v59 = vpop.permute.xlu1 %944 }
 0x201   :  { %1188 = vmatpush3.bf16.msra.mxu0 %v634_v16 }
 0x202   :  { %1189 = vmatprep.subr.bf16.mxu0 %v633_v33  ;;  %v703_v60 = vpop.permute.xlu0 %702  ;;  %v950_v61 = vpop.permute.xlu1 %949 }
 0x205   :  { %1190 = vmatpush3.bf16.msra.mxu0 %v633_v33 }
 0x206   :  { %1191 = vmatprep.subr.bf16.mxu0 %v632_v37  ;;  %v708_v62 = vpop.permute.xlu0 %707  ;;  %v955_v0 = vpop.permute.xlu1 %954 }
 0x209   :  { %1192 = vmatpush3.bf16.msra.mxu0 %v632_v37 }
 0x20a   :  { %1193 = vmatprep.subr.bf16.mxu0 %v631_v39  ;;  %v713_v5 = vpop.permute.xlu0 %712  ;;  %v960_v10 = vpop.permute.xlu1 %959 }
 0x20d   :  { %1194 = vmatpush3.bf16.msra.mxu0 %v631_v39 }
 0x20e   :  { %v718_v22 = vpop.permute.xlu0 %717  ;;  %v965_v25 = vpop.permute.xlu1 %964 }
 0x210   :  { %1196 = vmatmul.mubr.bf16.vlgmr.msra.gmra.mxu0 %v1233_v29 }
 0x211   :  { %1199 = vmatprep.mubr.bf16.mxu0 %v1234_v32 }
 0x212   :  { %v723_v39 = vpop.permute.xlu0 %722 }
 0x218   :  { %1200 = vmatmul.mubr.bf16.gmra.mxu0 %v1235_v30 }
 0x219   :  { %1203 = vmatprep.mubr.bf16.mxu0 %v1236_v40 }
 0x220   :  { %1204 = vmatmul.mubr.bf16.gmra.mxu0 %v1237_v41 }
 0x221   :  { %1207 = vmatprep.mubr.bf16.mxu0 %v1238_v42  ;;  %v970_v42 = vpop.permute.xlu1 %969 }
 0x228   :  { %1208 = vmatmul.mubr.bf16.gmra.mxu0 %v1239_v43 }
 0x2d0   :  { %v1197_v63 = vpop.f32.mrf.mxu0 }
 0x2d1   :  { %v826_v4 = vadd.f32 %v1197_v63, %v668_v46 }
 0x2d2   :  { %v817_v1 = vpop.f32.mrf.mxu0 }
 0x2d3   :  { %v818_v2 = vadd.f32 %v817_v1, %v658_v44  ;;  %v882_v12 = vmax.f32 %v826_v4, 0.0 }
 0x2d4   :  { %v1198_v3 = vpop.f32.mrf.mxu0 }
 0x2d5   :  { %v880_v7 = vmax.f32 %v818_v2, 0.0  ;;  %v829_v8 = vadd.f32 %v1198_v3, %v673_v47  ;;  %v994_v13 = vmul.f32 %v925_v52, %v882_v12  ;;  %v975_v2 = vpop.permute.xlu1 %974 }
 0x2d6   :  { %v820_v6 = vpop.f32.mrf.mxu0 }
 0x2d7   :  { %v821_v9 = vadd.f32 %v820_v6, %v663_v45  ;;  %v992_v19 = vmul.f32 %v915_v50, %v880_v7  ;;  %v883_v20 = vmax.f32 %v829_v8, 0.0 }
 0x2d8   :  { %v1201_v11 = vpop.f32.mrf.mxu0 }
 0x2d9   :  { %v881_v17 = vmax.f32 %v821_v9, 0.0  ;;  %v842_v14 = vadd.f32 %v1201_v11, %v688_v54  ;;  %v995_v27 = vmul.f32 %v930_v53, %v883_v20  ;;  %v728_v53 = vpop.permute.xlu0 %727 }
 0x2da   :  { %v833_v18 = vpop.f32.mrf.mxu0 }
 0x2db   :  { %v993_v21 = vmul.f32 %v920_v51, %v881_v17  ;;  %v834_v15 = vadd.f32 %v833_v18, %v678_v48  ;;  %v886_v36 = vmax.f32 %v842_v14, 0.0 }
 0x2dc   :  { %v1202_v23 = vpop.f32.mrf.mxu0 }
 0x2dd   :  { %v1008_v16 = vadd.f32 %v993_v21, %v992_v19  ;;  %v884_v24 = vmax.f32 %v834_v15, 0.0  ;;  %v845_v33 = vadd.f32 %v1202_v23, %v693_v56  ;;  %v998_v44 = vmul.f32 %v945_v59, %v886_v36  ;;  %v733_v9 = vpop.permute.xlu0 %732 }
 0x2de   :  { %v836_v26 = vpop.f32.mrf.mxu0 }
 0x2df   :  { %v1009_v28 = vadd.f32 %v1008_v16, %v994_v13  ;;  %v837_v34 = vadd.f32 %v836_v26, %v683_v49  ;;  %v996_v37 = vmul.f32 %v935_v55, %v884_v24  ;;  %v887_v30 = vmax.f32 %v845_v33, 0.0 }
 0x2e0   :  { %v1205_v35 = vpop.f32.mrf.mxu0  ;;  %v1035_v26 = vlaneseq }
 0x2e1   :  { %v1010_v31 = vadd.f32 %v1009_v28, %v995_v27  ;;  %v885_v38 = vmax.f32 %v837_v34, 0.0  ;;  %v858_v46 = vadd.f32 %v1205_v35, %v708_v62  ;;  %v999_v50 = vmul.f32 %v950_v61, %v887_v30 }
 0x2e2   :  { %v849_v29 = vpop.f32.mrf.mxu0  ;;  %v1036_v33 = vshrl.u32 %v1035_v26, 7 }
 0x2e3   :  { %v1011_v32 = vadd.f32 %v1010_v31, %v996_v37  ;;  %v997_v40 = vmul.f32 %v940_v57, %v885_v38  ;;  %v850_v41 = vadd.f32 %v849_v29, %v698_v58  ;;  %v890_v55 = vmax.f32 %v858_v46, 0.0 }
 0x2e4   :  { %v1206_v43 = vpop.f32.mrf.mxu0  ;;  %v1037_v36 = vsub.s32 0, %v1036_v33 }
 0x2e5   :  { %v1012_v45 = vadd.f32 %v1011_v32, %v997_v40  ;;  %v888_v47 = vmax.f32 %v850_v41, 0.0  ;;  %v861_v51 = vadd.f32 %v1206_v43, %v713_v5  ;;  %v1002_v62 = vmul.f32 %v965_v25, %v890_v55 }
 0x2e6   :  { %v852_v48 = vpop.f32.mrf.mxu0 }
 0x2e7   :  { %v1013_v49 = vadd.f32 %v1012_v45, %v998_v44  ;;  %v853_v52 = vadd.f32 %v852_v48, %v703_v60  ;;  %v1000_v56 = vmul.f32 %v955_v0, %v888_v47  ;;  %v891_v3 = vmax.f32 %v861_v51, 0.0  ;;  %v980_v0 = vpop.permute.xlu1 %979 }
 0x2e8   :  { %v1209_v54 = vpop.f32.mrf.mxu0 }
 0x2e9   :  { %v1014_v63 = vadd.f32 %v1013_v49, %v999_v50  ;;  %v889_v1 = vmax.f32 %v853_v52, 0.0  ;;  %v874_v8 = vadd.f32 %v1209_v54, %v728_v53  ;;  %v1003_v60 = vmul.f32 %v970_v42, %v891_v3 }
 0x2ea   :  { %v865_v57 = vpop.f32.mrf.mxu0 }
 0x2eb   :  { %v1015_v58 = vadd.f32 %v1014_v63, %v1000_v56  ;;  %v1001_v4 = vmul.f32 %v960_v10, %v889_v1  ;;  %v866_v59 = vadd.f32 %v865_v57, %v718_v22  ;;  %v894_v18 = vmax.f32 %v874_v8, 0.0  ;;  %v985_v22 = vpop.permute.xlu0 %984  ;;  %v990_v14 = vpop.permute.xlu1 %989 }
 0x2ec   :  { %v1210_v6 = vpop.f32.mrf.mxu0 }
 0x2ed   :  { %v1016_v7 = vadd.f32 %v1015_v58, %v1001_v4  ;;  %v892_v61 = vmax.f32 %v866_v59, 0.0  ;;  %v877_v12 = vadd.f32 %v1210_v6, %v733_v9  ;;  %v1006_v13 = vmul.f32 %v985_v22, %v894_v18 }
 0x2ee   :  { %v868_v5 = vpop.f32.mrf.mxu0 }
 0x2ef   :  { %v1017_v11 = vadd.f32 %v1016_v7, %v1002_v62  ;;  %v869_v17 = vadd.f32 %v868_v5, %v723_v39  ;;  %v1004_v19 = vmul.f32 %v975_v2, %v892_v61  ;;  %v895_v23 = vmax.f32 %v877_v12, 0.0  ;;  %v1033_v31 = vpop.permute.xlu0 %1032 }
 0x2f0   :  { %v1038_v39 = vrot.slane %v1033_v31, %v1037_v36 }
 0x2f1   :  { %v1018_v20 = vadd.f32 %v1017_v11, %v1003_v60  ;;  %v893_v21 = vmax.f32 %v869_v17, 0.0  ;;  %v1007_v24 = vmul.f32 %v990_v14, %v895_v23 }
 0x2f3   :  { %v1019_v15 = vadd.f32 %v1018_v20, %v1004_v19  ;;  %v1005_v10 = vmul.f32 %v980_v0, %v893_v21 }
 0x2f5   :  { %v1020_v16 = vadd.f32 %v1019_v15, %v1005_v10 }
 0x2f7   :  { %v1021_v25 = vadd.f32 %v1020_v16, %v1006_v13 }
 0x2f9   :  { %v1022_v27 = vadd.f32 %v1021_v25, %v1007_v24 }
 0x2fb   :  { %v1023_v28 = vrot.slane %v1022_v27, 4 }
 0x2fd   :  { %v1024_v34 = vadd.f32 %v1023_v28, %v1022_v27 }
 0x2ff   :  { %v1025_v35 = vrot.slane %v1024_v34, 2 }
 0x301   :  { %v1026_v37 = vadd.f32 %v1025_v35, %v1024_v34 }
 0x303   :  { %v1027_v38 = vrot.slane %v1026_v37, 1 }
 0x305   :  { %v1028_v29 = vadd.f32 %v1027_v38, %v1026_v37 }
 0x307   :  { %v1039_v32 = vadd.f32 %v1038_v39, %v1028_v29 }
 0x309   :  { %1040 = vst [vmem:[#allocation3] sm:$0x1] %v1039_v32 }
 0x30a   :  { %1251 = shalt.err (!%p1248_p4)
}
 0x30b   :  { %1050 = dma.vmem_to_hbm [thread:$0]  %s1048_s7, 16, %s1622_s9, [#allocation4]  }
 0x30c   :  { %1260 = dma.done.wait [#allocation4], 16  }
 0x30d   :  { %1261 = vsyncadd [#allocation4], 4294967280 }
 0x30e   :  { %1054 = vsyncpa [#allocation4], 1 }

</bundles_post_ra>
